<compile_context>
chip_gen: v6e
topology: v6e:2x2x1
jax: 0.10.0
libtpu: 0.0.40
codegen_flags: <defaults>
</compile_context>

<pallas_src>
import functools

import jax
import jax.numpy as jnp
from jax.experimental import pallas as pl
from jax.experimental.pallas import tpu as pltpu


# ----------------------------- helpers --------------------------------------

def _apply_act(y, act):
    if act == "relu":
        return jnp.maximum(y, 0.0)
    if act == "tanh":
        return jnp.tanh(y)
    return y


# ----------------------------- Pallas kernels ------------------------------

def _mlp_kernel(*refs, n_layers, act):
    """Fused MLP: all layers in one kernel. refs = (x, w0, b0, ..., o)."""
    x_ref = refs[0]
    o_ref = refs[-1]
    wb = refs[1:-1]
    y = x_ref[...]
    for i in range(n_layers):
        w = wb[2 * i][...]
        b = wb[2 * i + 1][...]
        y = jnp.dot(y, w, preferred_element_type=jnp.float32) + b
        if i < n_layers - 1:
            y = _apply_act(y, act)
    o_ref[...] = y.astype(o_ref.dtype)


def _decoder_kernel(*refs, n_tail_layers, act):
    """Fused decoder MLP with split first-layer weights (no concat needed).

    refs = (deter, stoc, w0_d, w0_s, b0, w1, b1, ..., o)
    """
    deter_ref, stoc_ref, w0d_ref, w0s_ref, b0_ref = refs[:5]
    o_ref = refs[-1]
    tail = refs[5:-1]
    y = jnp.dot(deter_ref[...], w0d_ref[...], preferred_element_type=jnp.float32)
    y = y + jnp.dot(stoc_ref[...], w0s_ref[...], preferred_element_type=jnp.float32)
    y = _apply_act(y + b0_ref[...], act)
    for i in range(n_tail_layers):
        w = tail[2 * i][...]
        b = tail[2 * i + 1][...]
        y = jnp.dot(y, w, preferred_element_type=jnp.float32) + b
        if i < n_tail_layers - 1:
            y = _apply_act(y, act)
    o_ref[...] = y.astype(o_ref.dtype)


def _rollout_kernel(embed_ref, a_ref, init_deter_ref, init_stoc_ref,
                    w_in_s_ref, w_in_a_ref, b_in_ref,
                    wx_r_ref, wx_z_ref, wx_n_ref,
                    wh_r_ref, wh_z_ref, wh_n_ref,
                    b_r_ref, b_z_ref, bx_n_ref, bh_n_ref,
                    wp_d_ref, wp_e_ref, bp_ref,
                    wm_ref, bm_ref,
                    deter_seq_ref, stoc_seq_ref,
                    deter_s, stoc_s, *, act):
    """One grid step = one RSSM timestep. State lives in VMEM scratch."""
    t = pl.program_id(0)

    @pl.when(t == 0)
    def _():
        deter_s[...] = init_deter_ref[...]
        stoc_s[...] = init_stoc_ref[...]

    deter = deter_s[...]
    stoc = stoc_s[...]
    embed = embed_ref[0]      # (Bp, deter_dim)
    action = a_ref[0]         # (Bp, action_dim)

    # rssm input embed: act(concat([stoc, action]) @ W + b)  -- split weights, no concat
    x = jnp.dot(stoc, w_in_s_ref[...], preferred_element_type=jnp.float32)
    x = x + jnp.dot(action, w_in_a_ref[...], preferred_element_type=jnp.float32)
    x = _apply_act(x + b_in_ref[...], act)

    # PyTorch-style GRUCell, per-gate weights (no lane-offset slices).
    r = jax.nn.sigmoid(
        jnp.dot(x, wx_r_ref[...], preferred_element_type=jnp.float32)
        + jnp.dot(deter, wh_r_ref[...], preferred_element_type=jnp.float32)
        + b_r_ref[...])
    z = jax.nn.sigmoid(
        jnp.dot(x, wx_z_ref[...], preferred_element_type=jnp.float32)
        + jnp.dot(deter, wh_z_ref[...], preferred_element_type=jnp.float32)
        + b_z_ref[...])
    n = jnp.tanh(
        jnp.dot(x, wx_n_ref[...], preferred_element_type=jnp.float32) + bx_n_ref[...]
        + r * (jnp.dot(deter, wh_n_ref[...], preferred_element_type=jnp.float32)
               + bh_n_ref[...]))
    deter_new = (1.0 - z) * n + z * deter

    # posterior: act(concat([deter, embed]) @ Wp + bp) -> mean head only
    ph = jnp.dot(deter_new, wp_d_ref[...], preferred_element_type=jnp.float32)
    ph = ph + jnp.dot(embed, wp_e_ref[...], preferred_element_type=jnp.float32)
    ph = _apply_act(ph + bp_ref[...], act)
    stoc_new = jnp.dot(ph, wm_ref[...], preferred_element_type=jnp.float32) + bm_ref[...]

    deter_s[...] = deter_new
    stoc_s[...] = stoc_new
    deter_seq_ref[0] = deter_new.astype(deter_seq_ref.dtype)
    stoc_seq_ref[0] = stoc_new.astype(stoc_seq_ref.dtype)


# --------------------------- parameter construction -------------------------

def _init_linear(key, fan_in, fan_out):
    kw, kb = jax.random.split(key)
    lim = 1.0 / jnp.sqrt(jnp.float32(fan_in))
    w = jax.random.uniform(kw, (fan_in, fan_out), jnp.float32, -lim, lim)
    b = jax.random.uniform(kb, (1, fan_out), jnp.float32, -lim, lim)
    return w, b


def _init_mlp(key, in_dim, hidden_sizes, out_dim):
    dims = [in_dim] + list(hidden_sizes) + [out_dim]
    keys = jax.random.split(key, len(dims) - 1)
    return [_init_linear(k, dims[i], dims[i + 1]) for i, k in enumerate(keys)]


class MultiStepDynamicsModelPallas:
    """JAX/Pallas re-implementation of MultiStepDynamicsModel's forward rollout."""

    def __init__(self, n_models, state_dim, action_dim, embed_dim, deter_dim,
                 stoc_dim, stoc_discrete_dim, gru_type, hidden_sizes,
                 activation="relu", seed=0):
        assert stoc_discrete_dim == 0, "continuous-stoc configuration implemented"
        assert stoc_dim >= 1, "stoc_dim == 0 not supported"  # TODO(synk): stoc_dim=0 path
        # TODO(synk): n_models ensembling and gru_type variants are carried but
        # the reference RSSMCell internals are not in the provided source; a
        # single standard GRU-based RSSM cell is implemented.
        self.n_models = n_models
        self.state_dim = state_dim
        self.action_dim = action_dim
        self.embed_dim = embed_dim
        self.deter_dim = deter_dim
        self.stoc_dim = stoc_dim
        self.stoc_discrete_dim = stoc_discrete_dim
        self.hidden_sizes = hidden_sizes
        self.activation = activation
        self.dist_dim = deter_dim + stoc_dim  # rssm.dist_dim (feature dim)

        key = jax.random.PRNGKey(seed)
        ks = jax.random.split(key, 6)
        # encoder: state_dim -> hidden_sizes -> deter_dim  (== embed fed to RSSM)
        self.encoder = _init_mlp(ks[0], state_dim, hidden_sizes, deter_dim)
        embed_feat = deter_dim
        h0 = hidden_sizes[0]
        d = deter_dim

        # --- RSSM cell parameters, pre-split for concat-free / slice-free kernels ---
        w_in, b_in = _init_linear(ks[1], stoc_dim + action_dim, h0)   # input embed
        self.w_in_s = w_in[:stoc_dim]                                 # (stoc, h0)
        self.w_in_a = w_in[stoc_dim:]                                 # (action, h0)
        self.b_in = b_in

        gwx, gbx = _init_linear(ks[2], h0, 3 * d)                     # GRU x gates
        gwh, gbh = _init_linear(ks[3], d, 3 * d)                      # GRU h gates
        self.wx_r, self.wx_z, self.wx_n = gwx[:, :d], gwx[:, d:2 * d], gwx[:, 2 * d:]
        self.wh_r, self.wh_z, self.wh_n = gwh[:, :d], gwh[:, d:2 * d], gwh[:, 2 * d:]
        self.b_r = gbx[:, :d] + gbh[:, :d]
        self.b_z = gbx[:, d:2 * d] + gbh[:, d:2 * d]
        self.bx_n = gbx[:, 2 * d:]
        self.bh_n = gbh[:, 2 * d:]

        wp, bp = _init_linear(ks[4], d + embed_feat, h0)              # posterior hidden
        self.wp_d = wp[:d]
        self.wp_e = wp[d:]
        self.bp = bp
        wm_full, bm_full = _init_linear(jax.random.fold_in(ks[4], 1), h0, 2 * stoc_dim)
        # TODO(synk): only the posterior mean head is used (deterministic rollout);
        # the std columns of post2 are dropped, matching the previous version's math.
        self.wm = wm_full[:, :stoc_dim]
        self.bm = bm_full[:, :stoc_dim]

        # decoder: dist_dim -> hidden_sizes -> state_dim (first layer split deter/stoc)
        self.decoder = _init_mlp(ks[5], self.dist_dim, hidden_sizes, state_dim)
        dec_w0, dec_b0 = self.decoder[0]
        self.dec_w0d = dec_w0[:d]
        self.dec_w0s = dec_w0[d:]
        self.dec_b0 = dec_b0
        self.dec_tail = self.decoder[1:]

    # ------------------------------------------------------------------ API

    def initial_state(self, batch_size):
        return {
            "deter": jnp.zeros((batch_size, self.deter_dim), jnp.float32),
            "stoc": jnp.zeros((batch_size, self.stoc_dim), jnp.float32),
        }

    # ------------------------------------------------------------ sub-calls

    def _encode(self, x_flat):
        """Fused encoder MLP over all rows at once."""
        args = [x_flat]
        for (w, b) in self.encoder:
            args += [w, b]
        vmem = pl.BlockSpec(memory_space=pltpu.MemorySpace.VMEM)
        return pl.pallas_call(
            functools.partial(_mlp_kernel, n_layers=len(self.encoder),
                              act=self.activation),
            in_specs=[vmem] * len(args),
            out_specs=vmem,
            out_shape=jax.ShapeDtypeStruct(
                (x_flat.shape[0], self.deter_dim), jnp.float32),
        )(*args)

    def _decode(self, deter_flat, stoc_flat):
        """Fused decoder MLP over all rows at once (split first-layer weight)."""
        args = [deter_flat, stoc_flat, self.dec_w0d, self.dec_w0s, self.dec_b0]
        for (w, b) in self.dec_tail:
            args += [w, b]
        vmem = pl.BlockSpec(memory_space=pltpu.MemorySpace.VMEM)
        return pl.pallas_call(
            functools.partial(_decoder_kernel, n_tail_layers=len(self.dec_tail),
                              act=self.activation),
            in_specs=[vmem] * len(args),
            out_specs=vmem,
            out_shape=jax.ShapeDtypeStruct(
                (deter_flat.shape[0], self.state_dim), jnp.float32),
        )(*args)

    def _rollout(self, embed_seq, action_seq, deter0, stoc0):
        """Fused recurrent rollout: one pallas_call, grid=(T,), VMEM-resident state."""
        T, Bp, _ = embed_seq.shape
        d, s, a = self.deter_dim, self.stoc_dim, self.action_dim

        def full(x):
            return pl.BlockSpec(x.shape, lambda t, _nd=x.ndim: (0,) * _nd)

        weights = [self.w_in_s, self.w_in_a, self.b_in,
                   self.wx_r, self.wx_z, self.wx_n,
                   self.wh_r, self.wh_z, self.wh_n,
                   self.b_r, self.b_z, self.bx_n, self.bh_n,
                   self.wp_d, self.wp_e, self.bp,
                   self.wm, self.bm]

        in_specs = [
            pl.BlockSpec((1, Bp, d), lambda t: (t, 0, 0)),   # embed_seq
            pl.BlockSpec((1, Bp, a), lambda t: (t, 0, 0)),   # action_seq
            full(deter0), full(stoc0),
        ] + [full(w) for w in weights]

        out_specs = [
            pl.BlockSpec((1, Bp, d), lambda t: (t, 0, 0)),
            pl.BlockSpec((1, Bp, s), lambda t: (t, 0, 0)),
        ]
        out_shape = [
            jax.ShapeDtypeStruct((T, Bp, d), jnp.float32),
            jax.ShapeDtypeStruct((T, Bp, s), jnp.float32),
        ]

        grid_spec = pltpu.PrefetchScalarGridSpec(
            num_scalar_prefetch=0,
            grid=(T,),
            in_specs=in_specs,
            out_specs=out_specs,
            scratch_shapes=[pltpu.VMEM((Bp, d), jnp.float32),
                            pltpu.VMEM((Bp, s), jnp.float32)],
        )
        deter_seq, stoc_seq = pl.pallas_call(
            functools.partial(_rollout_kernel, act=self.activation),
            grid_spec=grid_spec,
            out_shape=out_shape,
            compiler_params=pltpu.CompilerParams(
                dimension_semantics=("arbitrary",)),
        )(embed_seq, action_seq, deter0, stoc0, *weights)
        return deter_seq, stoc_seq

    # --------------------------------------------------------------- forward

    def forward(self, state_seq, action_seq, state=None):
        # state_seq: (T, B, state_dim), action_seq: (T, B, action_dim)
        T, B, _ = state_seq.shape
        # Pad batch to a multiple of 8 so MXU rows / vreg sublanes are filled.
        Bp = ((max(B, 1) + 7) // 8) * 8
        pad_b = Bp - B

        if state is None:
            deter0 = jnp.zeros((Bp, self.deter_dim), jnp.float32)
            stoc0 = jnp.zeros((Bp, self.stoc_dim), jnp.float32)
        else:
            deter0 = jnp.pad(state["deter"].astype(jnp.float32), ((0, pad_b), (0, 0)))
            stoc0 = jnp.pad(state["stoc"].astype(jnp.float32), ((0, pad_b), (0, 0)))

        ss = state_seq.astype(jnp.float32)
        aa = action_seq.astype(jnp.float32)
        if pad_b:
            ss = jnp.pad(ss, ((0, 0), (0, pad_b), (0, 0)))
            aa = jnp.pad(aa, ((0, 0), (0, pad_b), (0, 0)))

        # 1) Encoder over all T*Bp rows at once (hoisted out of the recurrent loop).
        embed_flat = self._encode(ss.reshape(T * Bp, self.state_dim))
        embed_seq = embed_flat.reshape(T, Bp, self.deter_dim)

        # 2) Fused sequential RSSM rollout (grid over time, state in VMEM scratch).
        deter_seq, stoc_seq = self._rollout(embed_seq, aa, deter0, stoc0)

        # 3) Decoder over all T*Bp feats at once (split-weight, no concat).
        preds_flat = self._decode(deter_seq.reshape(T * Bp, self.deter_dim),
                                  stoc_seq.reshape(T * Bp, self.stoc_dim))
        preds = preds_flat.reshape(T, Bp, self.state_dim)[:, :B]

        final_state = {"deter": deter_seq[-1, :B], "stoc": stoc_seq[-1, :B]}
        return preds, final_state


# ---------------------------------- main ------------------------------------

if __name__ == "__main__":
    n_models = 1
    state_dim, action_dim = 16, 4
    embed_dim, deter_dim = 32, 32
    stoc_dim, stoc_discrete_dim = 8, 0
    hidden_sizes = (32, 32)
    T, B = 8, 2

    model = MultiStepDynamicsModelPallas(
        n_models, state_dim, action_dim, embed_dim, deter_dim,
        stoc_dim, stoc_discrete_dim, gru_type="gru",
        hidden_sizes=hidden_sizes, activation="relu", seed=0)

    key = jax.random.PRNGKey(0)
    k1, k2 = jax.random.split(key)
    state_seq = jax.random.normal(k1, (T, B, state_dim), jnp.float32)
    action_seq = jax.random.normal(k2, (T, B, action_dim), jnp.float32)

    preds, final_state = model.forward(state_seq, action_seq)
    jax.block_until_ready(preds)
    jax.block_until_ready(final_state["deter"])
    jax.block_until_ready(final_state["stoc"])

    assert preds.shape == (T, B, state_dim)
    assert final_state["deter"].shape == (B, deter_dim)
    assert final_state["stoc"].shape == (B, stoc_dim)
    assert bool(jnp.all(jnp.isfinite(preds)))
    print("KERNEL_OK")
</pallas_src>

<mosaic_0001>
module attributes {stable_mosaic.version = 11 : i64} {
  func.func @_mlp_kernel(%arg0: memref<64x16xf32, #tpu.memory_space<vmem>>, %arg1: memref<16x32xf32, #tpu.memory_space<vmem>>, %arg2: memref<1x32xf32, #tpu.memory_space<vmem>>, %arg3: memref<32x32xf32, #tpu.memory_space<vmem>>, %arg4: memref<1x32xf32, #tpu.memory_space<vmem>>, %arg5: memref<32x32xf32, #tpu.memory_space<vmem>>, %arg6: memref<1x32xf32, #tpu.memory_space<vmem>>, %arg7: memref<64x32xf32, #tpu.memory_space<vmem>>) attributes {dimension_semantics = [], scalar_prefetch = 0 : i64, scratch_operands = 0 : i64, tpu.core_type = #tpu.core_type<tc>} {
    %c0 = arith.constant 0 : index
    %c0_0 = arith.constant 0 : index
    %0 = vector.load %arg0[%c0, %c0_0] : memref<64x16xf32, #tpu.memory_space<vmem>>, vector<64x16xf32>
    %c0_1 = arith.constant 0 : index
    %c0_2 = arith.constant 0 : index
    %1 = vector.load %arg1[%c0_1, %c0_2] : memref<16x32xf32, #tpu.memory_space<vmem>>, vector<16x32xf32>
    %c0_3 = arith.constant 0 : index
    %c0_4 = arith.constant 0 : index
    %2 = vector.load %arg2[%c0_3, %c0_4] : memref<1x32xf32, #tpu.memory_space<vmem>>, vector<1x32xf32>
    %cst = arith.constant dense<0.000000e+00> : vector<64x32xf32>
    %3 = tpu.matmul %0, %1, %cst {dimension_numbers = #tpu.dot_dimension_numbers<[1], [0], [0], [1], [0, 0, 1, 1], [], []>} : vector<64x16xf32>, vector<16x32xf32>, vector<64x32xf32> -> vector<64x32xf32>
    %4 = vector.broadcast %2 : vector<1x32xf32> to vector<64x32xf32>
    %5 = arith.addf %3, %4 : vector<64x32xf32>
    %cst_5 = arith.constant 0.000000e+00 : f32
    %6 = vector.broadcast %cst_5 : f32 to vector<64x32xf32>
    %7 = arith.maximumf %5, %6 : vector<64x32xf32>
    %c0_6 = arith.constant 0 : index
    %c0_7 = arith.constant 0 : index
    %8 = vector.load %arg3[%c0_6, %c0_7] : memref<32x32xf32, #tpu.memory_space<vmem>>, vector<32x32xf32>
    %c0_8 = arith.constant 0 : index
    %c0_9 = arith.constant 0 : index
    %9 = vector.load %arg4[%c0_8, %c0_9] : memref<1x32xf32, #tpu.memory_space<vmem>>, vector<1x32xf32>
    %cst_10 = arith.constant dense<0.000000e+00> : vector<64x32xf32>
    %10 = tpu.matmul %7, %8, %cst_10 {dimension_numbers = #tpu.dot_dimension_numbers<[1], [0], [0], [1], [0, 0, 1, 1], [], []>} : vector<64x32xf32>, vector<32x32xf32>, vector<64x32xf32> -> vector<64x32xf32>
    %11 = vector.broadcast %9 : vector<1x32xf32> to vector<64x32xf32>
    %12 = arith.addf %10, %11 : vector<64x32xf32>
    %cst_11 = arith.constant 0.000000e+00 : f32
    %13 = vector.broadcast %cst_11 : f32 to vector<64x32xf32>
    %14 = arith.maximumf %12, %13 : vector<64x32xf32>
    %c0_12 = arith.constant 0 : index
    %c0_13 = arith.constant 0 : index
    %15 = vector.load %arg5[%c0_12, %c0_13] : memref<32x32xf32, #tpu.memory_space<vmem>>, vector<32x32xf32>
    %c0_14 = arith.constant 0 : index
    %c0_15 = arith.constant 0 : index
    %16 = vector.load %arg6[%c0_14, %c0_15] : memref<1x32xf32, #tpu.memory_space<vmem>>, vector<1x32xf32>
    %cst_16 = arith.constant dense<0.000000e+00> : vector<64x32xf32>
    %17 = tpu.matmul %14, %15, %cst_16 {dimension_numbers = #tpu.dot_dimension_numbers<[1], [0], [0], [1], [0, 0, 1, 1], [], []>} : vector<64x32xf32>, vector<32x32xf32>, vector<64x32xf32> -> vector<64x32xf32>
    %18 = vector.broadcast %16 : vector<1x32xf32> to vector<64x32xf32>
    %19 = arith.addf %17, %18 : vector<64x32xf32>
    %c0_17 = arith.constant 0 : index
    %c0_18 = arith.constant 0 : index
    %20 = vector.load %arg7[%c0_17, %c0_18] : memref<64x32xf32, #tpu.memory_space<vmem>>, vector<64x32xf32>
    tpu.vector_store %arg7[%c0_17, %c0_18], %19 {strides = array<i32>} : memref<64x32xf32, #tpu.memory_space<vmem>>, vector<64x32xf32>,
    return
  }
}

</mosaic_0001>

<bundles_post_ra>
// kernel: tpu_custom_call.1
= control target key start
LH: loop header
LB: loop body
LE: loop exit
PB: predicated region body
PF: predicated region fallthrough
CT: control target
= control target key end

     0   :  { %vm43_vm0 = vcmask 130048   ;;  %vm192_vm1 = vcmask 261120   ;;  %s762_s1 = inlined_call_operand.vmem [shape: f32[16,32], index: 1, kind: input, shape index: {}]   ;;  %s763_s0 = inlined_call_operand.vmem [shape: f32[64,16], index: 0, kind: input, shape index: {}]   ;;  %s764_s3 = inlined_call_operand.vmem [shape: f32[32,32], index: 3, kind: input, shape index: {}]   ;;  %s765_s5 = inlined_call_operand.vmem [shape: f32[32,32], index: 5, kind: input, shape index: {}]   ;;  %s766_s2 = inlined_call_operand.vmem [shape: f32[1,32], index: 2, kind: input, shape index: {}]   ;;  %s767_s4 = inlined_call_operand.vmem [shape: f32[1,32], index: 4, kind: input, shape index: {}]   ;;  %s768_s6 = inlined_call_operand.vmem [shape: f32[1,32], index: 6, kind: input, shape index: {}]   ;;  %s769_s7 = inlined_call_operand.vmem [shape: f32[64,32], index: 7, kind: output, shape index: {}]  }
   0x1   :  { %v35_v0 = vld [vmem:[%s762_s1 + $0x8] sm:$0xff]  ;;  %v34_v1 = vld [vmem:[%s762_s1] sm:$0xff]  ;;  %v28_v4 = vld [vmem:[%s763_s0 + $0x10] sm:$0xff] }
   0x2   :  { %v26_v2 = vld [vmem:[%s763_s0] sm:$0xff]  ;;  %543 = vmatprep.subr.mxu0 %v35_v0  ;;  %v27_v3 = vld [vmem:[%s763_s0 + $0x8] sm:$0xff]  ;;  %599 = vmatprep.subr.mxu1 %v35_v0  ;;  %v184_v7 = vld [vmem:[%s764_s3 + $0x18] sm:$0xff] }
   0x3   :  { %547 = vmatprep.mubr.msk.f32.mxu0 %vm43_vm0, %v26_v2  ;;  %544 = vmatpush3.msra.mxu0 %v35_v0  ;;  %v30_v5 = vld [vmem:[%s763_s0 + $0x20] sm:$0xff]  ;;  %v31_v6 = vld [vmem:[%s763_s0 + $0x28] sm:$0xff]  ;;  %v32_v8 = vld [vmem:[%s763_s0 + $0x30] sm:$0xff] }
   0x4   :  { %545 = vmatprep.subr.mxu0 %v34_v1  ;;  %601 = vmatpush3.msra.mxu1 %v35_v0  ;;  %v29_v9 = vld [vmem:[%s763_s0 + $0x18] sm:$0xff]  ;;  %v183_v11 = vld [vmem:[%s764_s3 + $0x10] sm:$0xff]  ;;  %v182_v12 = vld [vmem:[%s764_s3 + $0x8] sm:$0xff] }
   0x5   :  { %546 = vmatpush3.msra.mxu0 %v34_v1  ;;  %600 = vmatprep.subr.mxu1 %v34_v1  ;;  %v33_v10 = vld [vmem:[%s763_s0 + $0x38] sm:$0xff]  ;;  %v181_v13 = vld [vmem:[%s764_s3] sm:$0xff]  ;;  %v332_v40 = vld [vmem:[%s765_s5 + $0x10] sm:$0xff] }
   0x6   :  { %548 = vmatmul.mubr.msk.f32.vlgmr.msra.gmra.mxu0 %vm43_vm0, %v27_v3  ;;  %602 = vmatpush3.msra.mxu1 %v34_v1  ;;  %v333_v14 = vld [vmem:[%s765_s5 + $0x18] sm:$0xff]  ;;  %v482_v15 = vld [vmem:[%s766_s2] ss:$0 sm:$0xff]  ;;  %v331_v41 = vld [vmem:[%s765_s5 + $0x8] sm:$0xff] }
   0x7   :  { %550 = vmatprep.mubr.msk.f32.mxu0 %vm43_vm0, %v28_v4  ;;  %553 = vmatprep.mubr.msk.f32.mxu1 %vm43_vm0, %v30_v5  ;;  %v330_v42 = vld [vmem:[%s765_s5] sm:$0xff] }
   0x8   :  { %554 = vmatmul.mubr.msk.f32.vlgmr.msra.gmra.mxu1 %vm43_vm0, %v31_v6  ;;  %559 = vmatprep.subr.mxu1 %v184_v7  ;;  %v491_v43 = vld [vmem:[%s767_s4] ss:$0 sm:$0xff] }
   0x9   :  { %556 = vmatprep.mubr.msk.f32.mxu1 %vm43_vm0, %v32_v8  ;;  %560 = vmatpush3.msra.mxu1 %v184_v7  ;;  %v500_v4 = vld [vmem:[%s768_s6] ss:$0 sm:$0xff] }
   0xa   :  { %551 = vmatmul.mubr.msk.f32.gmra.mxu0 %vm43_vm0, %v29_v9  ;;  %561 = vmatprep.subr.mxu1 %v183_v11 }
   0xb   :  { %562 = vmatpush3.msra.mxu1 %v183_v11  ;;  %579 = vmatprep.subr.mxu0 %v333_v14 }
   0xc   :  { %557 = vmatmul.mubr.msk.f32.gmra.mxu1 %vm43_vm0, %v33_v10  ;;  %563 = vmatprep.subr.mxu1 %v182_v12 }
   0xd   :  { %564 = vmatpush3.msra.mxu1 %v182_v12  ;;  %580 = vmatpush3.msra.mxu0 %v333_v14 }
   0xe   :  { %565 = vmatprep.subr.mxu1 %v181_v13  ;;  %581 = vmatprep.subr.mxu0 %v332_v40 }
   0xf   :  { %566 = vmatpush3.msra.mxu1 %v181_v13  ;;  %582 = vmatpush3.msra.mxu0 %v332_v40 }
  0x10   :  { %583 = vmatprep.subr.mxu0 %v331_v41 }
  0x11   :  { %584 = vmatpush3.msra.mxu0 %v331_v41 }
  0x12   :  { %585 = vmatprep.subr.mxu0 %v330_v42 }
  0x13   :  { %586 = vmatpush3.msra.mxu0 %v330_v42 }
  0xc6   :  { %v549_v16 = vpop.f32.mrf.mxu0 }
  0xc7   :  { %v140_v17 = vadd.f32 %v549_v16, %v482_v15 }
  0xc8   :  { %v134_v18 = vpop.f32.mrf.mxu0  ;;  %v555_v19 = vpop.f32.mrf.mxu1 }
  0xc9   :  { %v135_v20 = vadd.f32 %v482_v15, %v134_v18  ;;  %v174_v25 = vmax.f32 %v140_v17, 0.0  ;;  %v160_v35 = vadd.f32 %v555_v19, %v482_v15 }
  0xca   :  { %v552_v21 = vpop.f32.mrf.mxu0  ;;  %v154_v22 = vpop.f32.mrf.mxu1 }
  0xcb   :  { %v173_v23 = vmax.f32 %v135_v20, 0.0  ;;  %v155_v24 = vadd.f32 %v482_v15, %v154_v22  ;;  %v150_v26 = vadd.f32 %v552_v21, %v482_v15  ;;  %v178_v37 = vmax.f32 %v160_v35, 0.0 }
  0xcc   :  { %v144_v27 = vpop.f32.mrf.mxu0  ;;  %v558_v28 = vpop.f32.mrf.mxu1 }
  0xcd   :  { %v145_v29 = vadd.f32 %v482_v15, %v144_v27  ;;  %567 = vmatprep.mubr.msk.f32.mxu1 %vm192_vm1, %v173_v23  ;;  %v177_v32 = vmax.f32 %v155_v24, 0.0  ;;  %v176_v34 = vmax.f32 %v150_v26, 0.0  ;;  %v170_v38 = vadd.f32 %v558_v28, %v482_v15 }
  0xce   :  { %568 = vmatmul.mubr.msk.f32.vlgmr.msra.gmra.mxu1 %vm192_vm1, %v174_v25  ;;  %v164_v30 = vpop.f32.mrf.mxu1 }
  0xcf   :  { %v175_v31 = vmax.f32 %v145_v29, 0.0  ;;  %v165_v33 = vadd.f32 %v482_v15, %v164_v30  ;;  %v180_v39 = vmax.f32 %v170_v38, 0.0 }
  0xd1   :  { %570 = vmatprep.mubr.msk.f32.mxu1 %vm192_vm1, %v175_v31  ;;  %v179_v36 = vmax.f32 %v165_v33, 0.0 }
  0xd2   :  { %571 = vmatmul.mubr.msk.f32.gmra.mxu1 %vm192_vm1, %v176_v34 }
  0xd3   :  { %573 = vmatprep.mubr.msk.f32.mxu1 %vm192_vm1, %v177_v32 }
  0xd6   :  { %574 = vmatmul.mubr.msk.f32.gmra.mxu1 %vm192_vm1, %v178_v37 }
  0xd7   :  { %576 = vmatprep.mubr.msk.f32.mxu1 %vm192_vm1, %v179_v36 }
  0xda   :  { %577 = vmatmul.mubr.msk.f32.gmra.mxu1 %vm192_vm1, %v180_v39 }
 0x18e   :  { %v569_v44 = vpop.f32.mrf.mxu1 }
 0x18f   :  { %v289_v45 = vadd.f32 %v569_v44, %v491_v43 }
 0x190   :  { %v283_v46 = vpop.f32.mrf.mxu1 }
 0x191   :  { %v284_v47 = vadd.f32 %v491_v43, %v283_v46  ;;  %v323_v50 = vmax.f32 %v289_v45, 0.0 }
 0x192   :  { %v572_v48 = vpop.f32.mrf.mxu1 }
 0x193   :  { %v322_v49 = vmax.f32 %v284_v47, 0.0  ;;  %v299_v51 = vadd.f32 %v572_v48, %v491_v43 }
 0x194   :  { %v293_v52 = vpop.f32.mrf.mxu1 }
 0x195   :  { %v294_v53 = vadd.f32 %v491_v43, %v293_v52  ;;  %587 = vmatprep.mubr.msk.f32.mxu0 %vm192_vm1, %v322_v49  ;;  %v325_v56 = vmax.f32 %v299_v51, 0.0 }
 0x196   :  { %v575_v54 = vpop.f32.mrf.mxu1  ;;  %588 = vmatmul.mubr.msk.f32.vlgmr.msra.gmra.mxu0 %vm192_vm1, %v323_v50 }
 0x197   :  { %v324_v55 = vmax.f32 %v294_v53, 0.0  ;;  %v309_v57 = vadd.f32 %v575_v54, %v491_v43 }
 0x198   :  { %v303_v58 = vpop.f32.mrf.mxu1 }
 0x199   :  { %v304_v59 = vadd.f32 %v491_v43, %v303_v58  ;;  %590 = vmatprep.mubr.msk.f32.mxu0 %vm192_vm1, %v324_v55  ;;  %v327_v62 = vmax.f32 %v309_v57, 0.0 }
 0x19a   :  { %v578_v60 = vpop.f32.mrf.mxu1  ;;  %591 = vmatmul.mubr.msk.f32.gmra.mxu0 %vm192_vm1, %v325_v56 }
 0x19b   :  { %v326_v61 = vmax.f32 %v304_v59, 0.0  ;;  %v319_v63 = vadd.f32 %v578_v60, %v491_v43 }
 0x19c   :  { %v313_v0 = vpop.f32.mrf.mxu1 }
 0x19d   :  { %v314_v1 = vadd.f32 %v491_v43, %v313_v0  ;;  %593 = vmatprep.mubr.msk.f32.mxu0 %vm192_vm1, %v326_v61  ;;  %v329_v3 = vmax.f32 %v319_v63, 0.0 }
 0x19e   :  { %594 = vmatmul.mubr.msk.f32.gmra.mxu0 %vm192_vm1, %v327_v62 }
 0x19f   :  { %v328_v2 = vmax.f32 %v314_v1, 0.0 }
 0x1a1   :  { %596 = vmatprep.mubr.msk.f32.mxu0 %vm192_vm1, %v328_v2 }
 0x1a2   :  { %597 = vmatmul.mubr.msk.f32.gmra.mxu0 %vm192_vm1, %v329_v3 }
 0x256   :  { %v589_v5 = vpop.f32.mrf.mxu0 }
 0x257   :  { %v437_v6 = vadd.f32 %v589_v5, %v500_v4 }
 0x258   :  { %v431_v7 = vpop.f32.mrf.mxu0 }
 0x259   :  { %471 = vst.msk [vmem:[%s769_s7 + $0x8] sm:$0xff] %vm192_vm1, %v437_v6  ;;  %v432_v8 = vadd.f32 %v500_v4, %v431_v7 }
 0x25a   :  { %v592_v9 = vpop.f32.mrf.mxu0 }
 0x25b   :  { %470 = vst.msk [vmem:[%s769_s7] sm:$0xff] %vm192_vm1, %v432_v8  ;;  %v447_v10 = vadd.f32 %v592_v9, %v500_v4 }
 0x25c   :  { %v441_v11 = vpop.f32.mrf.mxu0 }
 0x25d   :  { %473 = vst.msk [vmem:[%s769_s7 + $0x18] sm:$0xff] %vm192_vm1, %v447_v10  ;;  %v442_v12 = vadd.f32 %v500_v4, %v441_v11 }
 0x25e   :  { %v595_v13 = vpop.f32.mrf.mxu0 }
 0x25f   :  { %472 = vst.msk [vmem:[%s769_s7 + $0x10] sm:$0xff] %vm192_vm1, %v442_v12  ;;  %v457_v14 = vadd.f32 %v595_v13, %v500_v4 }
 0x260   :  { %v451_v15 = vpop.f32.mrf.mxu0 }
 0x261   :  { %475 = vst.msk [vmem:[%s769_s7 + $0x28] sm:$0xff] %vm192_vm1, %v457_v14  ;;  %v452_v16 = vadd.f32 %v500_v4, %v451_v15 }
 0x262   :  { %v598_v17 = vpop.f32.mrf.mxu0 }
 0x263   :  { %474 = vst.msk [vmem:[%s769_s7 + $0x20] sm:$0xff] %vm192_vm1, %v452_v16  ;;  %v467_v18 = vadd.f32 %v598_v17, %v500_v4 }
 0x264   :  { %v461_v19 = vpop.f32.mrf.mxu0 }
 0x265   :  { %477 = vst.msk [vmem:[%s769_s7 + $0x38] sm:$0xff] %vm192_vm1, %v467_v18  ;;  %v462_v20 = vadd.f32 %v500_v4, %v461_v19 }
 0x267   :  { %476 = vst.msk [vmem:[%s769_s7 + $0x30] sm:$0xff] %vm192_vm1, %v462_v20 }

</bundles_post_ra>
